<compile_context>
chip_gen: v5e
topology: v5e:2x2
jax: 0.10.0
libtpu: 0.0.40
codegen_flags: <defaults>
</compile_context>

<pallas_src>
import functools
import numpy as np
import jax
import jax.numpy as jnp
from jax.experimental import pallas as pl
from jax.experimental.pallas import tpu as pltpu


C_PAD = 128   # feature dim padded to full lane width (lane-dense MXU + unmasked stores)
TM = 128      # target-node (row) tile
TN = 128      # source-node (column) tile


def _round_up(x, m):
    return (x + m - 1) // m * m


# -----------------------------------------------------------------------------
# Stage 1: node projection + per-node attention scalars, hoisted out of the
# O(N^2) adjacency sweep so the attention inner loop is pure adj streaming.
# -----------------------------------------------------------------------------
def _prep_kernel(x_ref, w_ref, emb_ref, att_i_ref, att_j_ref,
                 att_em_i_ref, att_em_j_ref,
                 xl_ref, s_i_ref, s_jT_ref):
    xl = jnp.dot(x_ref[...], w_ref[...], preferred_element_type=jnp.float32)  # (TM,C_PAD)
    emb = emb_ref[...]

    # target-node scalar, column vector (TM, 1)
    s_i = (jnp.sum(xl * att_i_ref[...], axis=-1, keepdims=True)
           + jnp.sum(emb * att_em_i_ref[...], axis=-1, keepdims=True))

    # source-node scalar, stored lane-major as a row vector (1, TM):
    # (1,C) x (TM,C) contracted over C  ==  att @ xl^T  (MXU, no explicit transpose)
    dn = (((1,), (1,)), ((), ()))
    s_jT = (jax.lax.dot_general(att_j_ref[...], xl, dn,
                                preferred_element_type=jnp.float32)
            + jax.lax.dot_general(att_em_j_ref[...], emb, dn,
                                  preferred_element_type=jnp.float32))

    xl_ref[...] = xl.astype(jnp.bfloat16)   # bf16 values: half the re-streamed HBM bytes
    s_i_ref[...] = s_i
    s_jT_ref[...] = s_jT


# -----------------------------------------------------------------------------
# Stage 2: tiled masked attention with online softmax (flash-style).
#   logits[i, j] = leaky_relu(s_i[i] + s_j[j], 0.2) ; row softmax over adj[i,:]>0
#   out[i]       = sum_j alpha[i, j] * xl[j] + bias
# Normalization by 1/denom is applied to the (TM, C_PAD) accumulator, not the
# (TM, TN) weights, and the reciprocal goes to the EUP (approx=True).
# -----------------------------------------------------------------------------
def _attn_kernel(s_i_ref, s_jT_ref, xl_ref, adj_ref, bias_ref, out_ref,
                 m_ref, l_ref, acc_ref):
    k = pl.program_id(1)

    @pl.when(k == 0)
    def _():
        m_ref[...] = jnp.full_like(m_ref, -1e30)   # finite: avoids inf-inf NaNs
        l_ref[...] = jnp.zeros_like(l_ref)
        acc_ref[...] = jnp.zeros_like(acc_ref)

    logits = s_i_ref[...] + s_jT_ref[...]          # (TM, TN) broadcast add
    logits = jnp.maximum(logits, 0.2 * logits)     # leaky_relu(negative_slope=0.2)

    valid = adj_ref[...].astype(jnp.float32)       # 0/1 mask (int8 in HBM)
    masked = logits + (valid - 1.0) * 1e30         # -1e30 where no edge

    m_prev = m_ref[...]
    m_new = jnp.maximum(m_prev, jnp.max(masked, axis=-1, keepdims=True))
    corr = jnp.exp(m_prev - m_new)
    p = jnp.exp(masked - m_new) * valid            # exact zeros off-graph

    l_ref[...] = corr * l_ref[...] + jnp.sum(p, axis=-1, keepdims=True)
    acc_ref[...] = corr * acc_ref[...] + jnp.dot(
        p.astype(jnp.bfloat16), xl_ref[...], preferred_element_type=jnp.float32)
    m_ref[...] = m_new

    @pl.when(k == pl.num_programs(1) - 1)
    def _():
        inv_l = pl.reciprocal(l_ref[...], approx=True)
        out_ref[...] = acc_ref[...] * inv_l + bias_ref[...]


# -----------------------------------------------------------------------------
# Stage 3: BatchNorm1d (training-mode batch statistics, eps=1e-5) + ReLU,
# computed over the first n_valid (real) rows only.
# TODO(synk): for very large N this finalize should be a two-pass row-tiled
# sum/sumsq reduction; at these sizes a single VMEM block is sufficient.
# -----------------------------------------------------------------------------
def _bn_relu_kernel(y_ref, gamma_ref, beta_ref, out_ref, *, n_valid):
    y = y_ref[...]
    rows = jax.lax.broadcasted_iota(jnp.int32, (y.shape[0], 1), 0)
    rmask = (rows < n_valid).astype(jnp.float32)
    inv_n = 1.0 / float(n_valid)
    mu = jnp.sum(y * rmask, axis=0, keepdims=True) * inv_n
    d = (y - mu) * rmask
    var = jnp.sum(d * d, axis=0, keepdims=True) * inv_n
    yhat = (y - mu) * jax.lax.rsqrt(var + 1e-5)
    out = yhat * gamma_ref[...] + beta_ref[...]
    out_ref[...] = jnp.maximum(out, 0.0)


# -----------------------------------------------------------------------------
# Wrapper: pads N to a tile multiple, pads the feature dim to 128 lanes,
# builds the padded int8 adjacency (padded rows get a self loop so their
# softmax denominator is never zero), and runs the three pallas_calls.
# -----------------------------------------------------------------------------
def gnn_layer_forward(x, w, emb, att_i, att_j, att_em_i, att_em_j,
                      adj, bias, gamma, beta):
    N, F_in = x.shape
    C = w.shape[1]
    assert C <= C_PAD and emb.shape == (N, C) and adj.shape == (N, N)
    N_pad = _round_up(N, max(TM, TN))
    gr, gc = N_pad // TM, N_pad // TN
    f32 = jnp.float32

    def pad2(a, r, c):
        a = a.astype(f32)
        return jnp.pad(a, ((0, r - a.shape[0]), (0, c - a.shape[1])))

    x_p = pad2(x, N_pad, F_in)
    w_p = pad2(w, F_in, C_PAD)
    emb_p = pad2(emb, N_pad, C_PAD)
    att_i_p = pad2(att_i, 1, C_PAD)
    att_j_p = pad2(att_j, 1, C_PAD)
    att_em_i_p = pad2(att_em_i, 1, C_PAD)
    att_em_j_p = pad2(att_em_j, 1, C_PAD)
    bias_p = pad2(bias, 1, C_PAD)
    gamma_p = pad2(gamma, 1, C_PAD)
    beta_p = pad2(beta, 1, C_PAD)

    # int8 adjacency (0/1): 4x less HBM traffic / VMEM than f32 for the dominant stream.
    adj_p = jnp.zeros((N_pad, N_pad), jnp.int8).at[:N, :N].set(adj.astype(jnp.int8))
    pad_idx = jnp.arange(N, N_pad)
    adj_p = adj_p.at[pad_idx, pad_idx].set(1)   # self loops for padded rows

    # ---- Stage 1 -------------------------------------------------------------
    xl_bf16, s_i, s_jT = pl.pallas_call(
        _prep_kernel,
        grid=(gr,),
        in_specs=[
            pl.BlockSpec((TM, F_in), lambda i: (i, 0)),
            pl.BlockSpec((F_in, C_PAD), lambda i: (0, 0)),
            pl.BlockSpec((TM, C_PAD), lambda i: (i, 0)),
            pl.BlockSpec((1, C_PAD), lambda i: (0, 0)),
            pl.BlockSpec((1, C_PAD), lambda i: (0, 0)),
            pl.BlockSpec((1, C_PAD), lambda i: (0, 0)),
            pl.BlockSpec((1, C_PAD), lambda i: (0, 0)),
        ],
        out_specs=(
            pl.BlockSpec((TM, C_PAD), lambda i: (i, 0)),
            pl.BlockSpec((TM, 1), lambda i: (i, 0)),
            pl.BlockSpec((1, TM), lambda i: (0, i)),
        ),
        out_shape=(
            jax.ShapeDtypeStruct((N_pad, C_PAD), jnp.bfloat16),
            jax.ShapeDtypeStruct((N_pad, 1), jnp.float32),
            jax.ShapeDtypeStruct((1, N_pad), jnp.float32),
        ),
        compiler_params=pltpu.CompilerParams(dimension_semantics=("parallel",)),
    )(x_p, w_p, emb_p, att_i_p, att_j_p, att_em_i_p, att_em_j_p)

    # ---- Stage 2 -------------------------------------------------------------
    # VMEM budget from the chosen tiles (double-buffered inputs/outputs + scratch),
    # kept well under the v7x 64 MiB physical VMEM.
    tile_bytes = (TM * TN            # adj int8
                  + TN * C_PAD * 2   # xl bf16
                  + TM * C_PAD * 4   # out f32
                  + TM * 4 + TN * 4 + C_PAD * 4)
    scratch_bytes = 2 * TM * 4 + TM * C_PAD * 4
    vmem_limit = int(min(48 * 2**20, max(8 * 2**20, 4 * (2 * tile_bytes + scratch_bytes))))

    cost = pl.CostEstimate(
        flops=2 * N_pad * N_pad * C_PAD + 10 * N_pad * N_pad,
        transcendentals=N_pad * N_pad,
        bytes_accessed=N_pad * N_pad + gr * N_pad * C_PAD * 2 + N_pad * C_PAD * 4,
    )

    out_pre = pl.pallas_call(
        _attn_kernel,
        grid=(gr, gc),
        in_specs=[
            pl.BlockSpec((TM, 1), lambda i, k: (i, 0)),        # s_i
            pl.BlockSpec((1, TN), lambda i, k: (0, k)),        # s_j (row-major)
            pl.BlockSpec((TN, C_PAD), lambda i, k: (k, 0)),    # values xl (bf16)
            pl.BlockSpec((TM, TN), lambda i, k: (i, k)),       # adj mask (int8)
            pl.BlockSpec((1, C_PAD), lambda i, k: (0, 0)),     # bias
        ],
        out_specs=pl.BlockSpec((TM, C_PAD), lambda i, k: (i, 0)),
        out_shape=jax.ShapeDtypeStruct((N_pad, C_PAD), jnp.float32),
        scratch_shapes=[
            pltpu.VMEM((TM, 1), jnp.float32),      # running max
            pltpu.VMEM((TM, 1), jnp.float32),      # running denom
            pltpu.VMEM((TM, C_PAD), jnp.float32),  # running weighted sum
        ],
        compiler_params=pltpu.CompilerParams(
            dimension_semantics=("parallel", "arbitrary"),
            vmem_limit_bytes=vmem_limit),
        cost_estimate=cost,
    )(s_i, s_jT, xl_bf16, adj_p, bias_p)

    # ---- Stage 3 -------------------------------------------------------------
    out_bn = pl.pallas_call(
        functools.partial(_bn_relu_kernel, n_valid=N),
        in_specs=[pl.BlockSpec(memory_space=pltpu.MemorySpace.VMEM)] * 3,
        out_specs=pl.BlockSpec(memory_space=pltpu.MemorySpace.VMEM),
        out_shape=jax.ShapeDtypeStruct((N_pad, C_PAD), jnp.float32),
    )(out_pre, gamma_p, beta_p)

    return out_bn[:N, :C]


def build_adj(edge_index, num_nodes):
    """remove_self_loops + add_self_loops, densified: adj[i, j] = 1 iff edge j -> i."""
    src, dst = np.asarray(edge_index)
    keep = src != dst
    src, dst = src[keep], dst[keep]
    adj = np.zeros((num_nodes, num_nodes), dtype=np.int8)
    adj[dst, src] = 1
    idx = np.arange(num_nodes)
    adj[idx, idx] = 1   # added self loops
    return adj


if __name__ == "__main__":
    # Small shapes: N nodes, in_channel=F_in, out_channel=C (== embedding dim), heads=1.
    # N=200 pads to 256 -> a 2x2 tile grid, exercising the online softmax.
    N, F_in, C = 200, 16, 8
    key = jax.random.PRNGKey(0)
    ks = jax.random.split(key, 7)

    x = jax.random.normal(ks[0], (N, F_in), jnp.float32)
    emb = jax.random.normal(ks[1], (N, C), jnp.float32)

    # Deterministic parameter init (module __init__/reset_parameters shapes).
    # reset_parameters() zeroes att_em_* and bias; small nonzero values are used
    # to exercise the embedding/bias path (same semantics).
    w = jax.random.normal(ks[2], (F_in, C), jnp.float32) * (1.0 / np.sqrt(F_in))
    att_i = jax.random.normal(ks[3], (1, C), jnp.float32) * 0.5
    att_j = jax.random.normal(ks[4], (1, C), jnp.float32) * 0.5
    att_em_i = jax.random.normal(ks[5], (1, C), jnp.float32) * 0.1
    att_em_j = jax.random.normal(ks[6], (1, C), jnp.float32) * 0.1
    bias = jnp.zeros((1, C), jnp.float32)    # GraphLayer.bias
    gamma = jnp.ones((1, C), jnp.float32)    # BatchNorm1d.weight
    beta = jnp.zeros((1, C), jnp.float32)    # BatchNorm1d.bias

    # Deterministic graph: bidirectional ring + a chord per node.
    idx = np.arange(N)
    src = np.concatenate([idx, (idx + 1) % N, idx])
    dst = np.concatenate([(idx + 1) % N, idx, (idx + 7) % N])
    edge_index = np.stack([src, dst])
    adj = jnp.asarray(build_adj(edge_index, N))   # (N, N) int8 0/1 mask

    out = gnn_layer_forward(x, w, emb, att_i, att_j, att_em_i, att_em_j,
                            adj, bias, gamma, beta)
    jax.block_until_ready(out)
    assert out.shape == (N, C) and bool(jnp.all(jnp.isfinite(out)))
    print("KERNEL_OK")
</pallas_src>

<mosaic_0001>
module attributes {stable_mosaic.version = 11 : i64} {
  func.func @_prep_kernel(%arg0: i32, %arg1: memref<128x16xf32, #tpu.memory_space<vmem>>, %arg2: memref<16x128xf32, #tpu.memory_space<vmem>>, %arg3: memref<128x128xf32, #tpu.memory_space<vmem>>, %arg4: memref<1x128xf32, #tpu.memory_space<vmem>>, %arg5: memref<1x128xf32, #tpu.memory_space<vmem>>, %arg6: memref<1x128xf32, #tpu.memory_space<vmem>>, %arg7: memref<1x128xf32, #tpu.memory_space<vmem>>, %arg8: memref<128x128xbf16, #tpu.memory_space<vmem>>, %arg9: memref<128x1xf32, #tpu.memory_space<vmem>>, %arg10: memref<1x128xf32, #tpu.memory_space<vmem>>) attributes {dimension_semantics = [#tpu.dimension_semantics<parallel>], iteration_bounds = array<i64: 2>, scalar_prefetch = 0 : i64, scratch_operands = 0 : i64, tpu.core_type = #tpu.core_type<tc>, window_params = [{transform_indices = @transform_0, window_bounds = array<i64: 128, 16>}, {pipeline_mode = #tpu.pipeline_mode<synchronous>, transform_indices = @transform_1, window_bounds = array<i64: 16, 128>}, {transform_indices = @transform_2, window_bounds = array<i64: 128, 128>}, {pipeline_mode = #tpu.pipeline_mode<synchronous>, transform_indices = @transform_3, window_bounds = array<i64: 1, 128>}, {pipeline_mode = #tpu.pipeline_mode<synchronous>, transform_indices = @transform_4, window_bounds = array<i64: 1, 128>}, {pipeline_mode = #tpu.pipeline_mode<synchronous>, transform_indices = @transform_5, window_bounds = array<i64: 1, 128>}, {pipeline_mode = #tpu.pipeline_mode<synchronous>, transform_indices = @transform_6, window_bounds = array<i64: 1, 128>}, {transform_indices = @transform_7, window_bounds = array<i64: 128, 128>}, {transform_indices = @transform_8, window_bounds = array<i64: 128, 1>}, {transform_indices = @transform_9, window_bounds = array<i64: 1, 128>}]} {
    %c0 = arith.constant 0 : index
    %c0_0 = arith.constant 0 : index
    %0 = vector.load %arg1[%c0, %c0_0] : memref<128x16xf32, #tpu.memory_space<vmem>>, vector<128x16xf32>
    %c0_1 = arith.constant 0 : index
    %c0_2 = arith.constant 0 : index
    %1 = vector.load %arg2[%c0_1, %c0_2] : memref<16x128xf32, #tpu.memory_space<vmem>>, vector<16x128xf32>
    %cst = arith.constant dense<0.000000e+00> : vector<128x128xf32>
    %2 = tpu.matmul %0, %1, %cst {dimension_numbers = #tpu.dot_dimension_numbers<[1], [0], [0], [1], [0, 0, 1, 1], [], []>} : vector<128x16xf32>, vector<16x128xf32>, vector<128x128xf32> -> vector<128x128xf32>
    %c0_3 = arith.constant 0 : index
    %c0_4 = arith.constant 0 : index
    %3 = vector.load %arg3[%c0_3, %c0_4] : memref<128x128xf32, #tpu.memory_space<vmem>>, vector<128x128xf32>
    %c0_5 = arith.constant 0 : index
    %c0_6 = arith.constant 0 : index
    %4 = vector.load %arg4[%c0_5, %c0_6] : memref<1x128xf32, #tpu.memory_space<vmem>>, vector<1x128xf32>
    %5 = vector.broadcast %4 : vector<1x128xf32> to vector<128x128xf32>
    %6 = arith.mulf %2, %5 : vector<128x128xf32>
    %cst_7 = arith.constant dense<0.000000e+00> : vector<128xf32>
    %7 = vector.multi_reduction <add>, %6, %cst_7 [1] : vector<128x128xf32> to vector<128xf32>
    %8 = vector.shape_cast %7 : vector<128xf32> to vector<128x1xf32>
    %c0_8 = arith.constant 0 : index
    %c0_9 = arith.constant 0 : index
    %9 = vector.load %arg6[%c0_8, %c0_9] : memref<1x128xf32, #tpu.memory_space<vmem>>, vector<1x128xf32>
    %10 = vector.broadcast %9 : vector<1x128xf32> to vector<128x128xf32>
    %11 = arith.mulf %3, %10 : vector<128x128xf32>
    %cst_10 = arith.constant dense<0.000000e+00> : vector<128xf32>
    %12 = vector.multi_reduction <add>, %11, %cst_10 [1] : vector<128x128xf32> to vector<128xf32>
    %13 = vector.shape_cast %12 : vector<128xf32> to vector<128x1xf32>
    %14 = arith.addf %8, %13 : vector<128x1xf32>
    %c0_11 = arith.constant 0 : index
    %c0_12 = arith.constant 0 : index
    %15 = vector.load %arg5[%c0_11, %c0_12] : memref<1x128xf32, #tpu.memory_space<vmem>>, vector<1x128xf32>
    %cst_13 = arith.constant dense<0.000000e+00> : vector<1x128xf32>
    %16 = tpu.matmul %15, %2, %cst_13 {dimension_numbers = #tpu.dot_dimension_numbers<[1], [1], [0], [0], [0, 0, 1, 0], [], []>} : vector<1x128xf32>, vector<128x128xf32>, vector<1x128xf32> -> vector<1x128xf32>
    %c0_14 = arith.constant 0 : index
    %c0_15 = arith.constant 0 : index
    %17 = vector.load %arg7[%c0_14, %c0_15] : memref<1x128xf32, #tpu.memory_space<vmem>>, vector<1x128xf32>
    %cst_16 = arith.constant dense<0.000000e+00> : vector<1x128xf32>
    %18 = tpu.matmul %17, %3, %cst_16 {dimension_numbers = #tpu.dot_dimension_numbers<[1], [1], [0], [0], [0, 0, 1, 0], [], []>} : vector<1x128xf32>, vector<128x128xf32>, vector<1x128xf32> -> vector<1x128xf32>
    %19 = arith.addf %16, %18 : vector<1x128xf32>
    %20 = arith.truncf %2 : vector<128x128xf32> to vector<128x128xbf16>
    %c0_17 = arith.constant 0 : index
    %c0_18 = arith.constant 0 : index
    %21 = vector.load %arg8[%c0_17, %c0_18] : memref<128x128xbf16, #tpu.memory_space<vmem>>, vector<128x128xbf16>
    tpu.vector_store %arg8[%c0_17, %c0_18], %20 {strides = array<i32>} : memref<128x128xbf16, #tpu.memory_space<vmem>>, vector<128x128xbf16>,
    %c0_19 = arith.constant 0 : index
    %c0_20 = arith.constant 0 : index
    %22 = vector.load %arg9[%c0_19, %c0_20] : memref<128x1xf32, #tpu.memory_space<vmem>>, vector<128x1xf32>
    tpu.vector_store %arg9[%c0_19, %c0_20], %14 {strides = array<i32>} : memref<128x1xf32, #tpu.memory_space<vmem>>, vector<128x1xf32>,
    %c0_21 = arith.constant 0 : index
    %c0_22 = arith.constant 0 : index
    %23 = vector.load %arg10[%c0_21, %c0_22] : memref<1x128xf32, #tpu.memory_space<vmem>>, vector<1x128xf32>
    tpu.vector_store %arg10[%c0_21, %c0_22], %19 {strides = array<i32>} : memref<1x128xf32, #tpu.memory_space<vmem>>, vector<1x128xf32>,
    return
  }
  func.func @transform_0(%arg0: i32) -> (i32, i32) {
    %c0_i32 = arith.constant 0 : i32
    %c0_i32_0 = arith.constant 0 : i32
    return %arg0, %c0_i32 : i32, i32
  }
  func.func @transform_1(%arg0: i32) -> (i32, i32) {
    %c0_i32 = arith.constant 0 : i32
    %c0_i32_0 = arith.constant 0 : i32
    %c0_i32_1 = arith.constant 0 : i32
    return %c0_i32, %c0_i32_0 : i32, i32
  }
  func.func @transform_2(%arg0: i32) -> (i32, i32) {
    %c0_i32 = arith.constant 0 : i32
    %c0_i32_0 = arith.constant 0 : i32
    return %arg0, %c0_i32 : i32, i32
  }
  func.func @transform_3(%arg0: i32) -> (i32, i32) {
    %c0_i32 = arith.constant 0 : i32
    %c0_i32_0 = arith.constant 0 : i32
    %c0_i32_1 = arith.constant 0 : i32
    return %c0_i32, %c0_i32_0 : i32, i32
  }
  func.func @transform_4(%arg0: i32) -> (i32, i32) {
    %c0_i32 = arith.constant 0 : i32
    %c0_i32_0 = arith.constant 0 : i32
    %c0_i32_1 = arith.constant 0 : i32
    return %c0_i32, %c0_i32_0 : i32, i32
  }
  func.func @transform_5(%arg0: i32) -> (i32, i32) {
    %c0_i32 = arith.constant 0 : i32
    %c0_i32_0 = arith.constant 0 : i32
    %c0_i32_1 = arith.constant 0 : i32
    return %c0_i32, %c0_i32_0 : i32, i32
  }
  func.func @transform_6(%arg0: i32) -> (i32, i32) {
    %c0_i32 = arith.constant 0 : i32
    %c0_i32_0 = arith.constant 0 : i32
    %c0_i32_1 = arith.constant 0 : i32
    return %c0_i32, %c0_i32_0 : i32, i32
  }
  func.func @transform_7(%arg0: i32) -> (i32, i32) {
    %c0_i32 = arith.constant 0 : i32
    %c0_i32_0 = arith.constant 0 : i32
    return %arg0, %c0_i32 : i32, i32
  }
  func.func @transform_8(%arg0: i32) -> (i32, i32) {
    %c0_i32 = arith.constant 0 : i32
    %c0_i32_0 = arith.constant 0 : i32
    return %arg0, %c0_i32 : i32, i32
  }
  func.func @transform_9(%arg0: i32) -> (i32, i32) {
    %c0_i32 = arith.constant 0 : i32
    %c0_i32_0 = arith.constant 0 : i32
    return %c0_i32, %arg0 : i32, i32
  }
}

</mosaic_0001>

<bundles_post_ra>
// kernel: tpu_custom_call.1
= control target key start
LH: loop header
LB: loop body
LE: loop exit
PB: predicated region body
PF: predicated region fallthrough
CT: control target
= control target key end

     0   :  { %s1551_s0 = inlined_call_operand.vmem [shape: f32[256,16], index: 0, kind: input, shape index: {}]   ;;  %s1552_s1 = inlined_call_operand.vmem [shape: f32[16,128], index: 1, kind: input, shape index: {}]   ;;  %s1553_s2 = inlined_call_operand.vmem [shape: f32[256,128], index: 2, kind: input, shape index: {}]   ;;  %s1554_s3 = inlined_call_operand.vmem [shape: f32[1,128], index: 3, kind: input, shape index: {}]   ;;  %s1555_s4 = inlined_call_operand.vmem [shape: f32[1,128], index: 4, kind: input, shape index: {}]   ;;  %s1556_s5 = inlined_call_operand.vmem [shape: f32[1,128], index: 5, kind: input, shape index: {}]   ;;  %s1557_s6 = inlined_call_operand.vmem [shape: f32[1,128], index: 6, kind: input, shape index: {}]   ;;  %s1558_s7 = inlined_call_operand.hbm [shape: bf16[256,128], index: 7, kind: output, shape index: {0}]   ;;  %s1559_s8 = inlined_call_operand.vmem [shape: f32[256,1], index: 8, kind: output, shape index: {1}]   ;;  %s1560_s9 = inlined_call_operand.hbm [shape: f32[1,256], index: 9, kind: output, shape index: {2}]  }
   0x1   :  { %1561 = sst [smem:[#allocation8_spill]] %s1551_s0 }
   0x2   :  { %1562 = sst [smem:[#allocation9_spill]] %s1552_s1 }
   0x3   :  { %1563 = sst [smem:[#allocation10_spill]] %s1553_s2 }
   0x4   :  { %15 = vsyncpa [#allocation3], 0 }
   0x5   :  { %17 = vsyncpa [#allocation3 + $0x1], 0 }
   0x6   :  { %18 = vsyncpa [#allocation5], 0 }
   0x7   :  { %20 = vsyncpa [#allocation5 + $0x1], 0  ;;  %s1186_s30 = smov 0   ;;  %s1188_s10 = smov 0  }
   0x8   :  { %s1190_s11 = smov 0   ;;  %s1192_s12 = smov 0  }
   0x9 LB: > { %s1207_s13 = sadd.s32 4294967295, %s1132_s12   ;;  %s908_s14 = sadd.s32 4294967294, %s1132_s12   ;;  %s1132_s12 = sphi %s1192_s12, %s1572_s12   ;;  %s1128_s11 = sphi %s1190_s11, %s1571_s11   ;;  %s1124_s10 = sphi %s1188_s10, %s1570_s10   ;;  %s1120_s30 = sphi %s1186_s30, %s1569_s30  }
   0xa   : > { %s1211_s15 = sadd.s32 1, %s1132_s12   ;;  %s190_s16 = sadd.s32 1, %s1128_s11 }
   0xb   : > { %s187_s17 = ssub.s32 %s1132_s12, %s1211_s15  ;;  %p200_p0 = scmp.ne.s32.totalorder %s1128_s11, %s1124_s10 }
   0xc   : > { %p188_p1 = scmp.eq.s32.totalorder %s187_s17, 0  ;;  %p201_p2 = scmp.eq.s32.totalorder %s1207_s13, 1 }
   0xd   : > { %p206_p3 = scmp.ne.s32.totalorder %s1124_s10, %s1120_s30  ;;  %p207_p4 = scmp.eq.s32.totalorder %s908_s14, 1 }
   0xe   : > { %s1222_s18 = scalar_select %p188_p1, %s1128_s11, %s190_s16  }
   0xf   : > { %p1224_p5 = por %p201_p2, %p200_p0  ;;  %p1228_p6 = por %p207_p4, %p206_p3 }
  0x10   : > { %p911_p7 = scmp.ge.s32.totalorder %s1132_s12, 1  ;;  %p310_p8 = scmp.lt.s32.totalorder %s1132_s12, 3 }
  0x12   : > { %p311_p9 = pnand %p911_p7, %p310_p8 }
  0x13   : > { %s1566_s1 = sld [smem:[#allocation9_spill]] (!%p311_p9)  ;;  %s913_s25 = sshll.u32 (!%p311_p9), %s1207_s13, 4 }
  0x14   : > { %314 = sbr.rel (%p311_p9) target bundleno = 409 (0x199), region = 48  ;;  %p361_p10 = scmp.lt.s32.totalorder (!%p311_p9), %s913_s25, 31 }
  0x15   : > { %s1567_s0 = sld [smem:[#allocation8_spill]] (!%p311_p9)  ;;  %s940_s24 = sshll.u32 (!%p311_p9), %s1207_s13, 6 }
  0x16   : > { %s1568_s2 = sld [smem:[#allocation10_spill]] (!%p311_p9)  ;;  %s760_s14 = scalar_lea.hbm (!%p311_p9), %s1558_s7, %s940_s24 }
  0x19   : > { %v396_v0 = vld [vmem:[%s1566_s1 + $0x8] sm:$0xff]  ;;  %v395_v1 = vld [vmem:[%s1566_s1] sm:$0xff]  ;;  %s1574_s25 = smov (!%p361_p10, %s913_s25), 31  ;;  %vm397_vm0 = vcmask 130048   ;;  %vm721_vm1 = vcmask 7168  }
  0x1a   : > { %460 = vmatpush.msra.mxu0 %v396_v0  ;;  %988 = vmatpush.msra.mxu3 %v396_v0  ;;  %s1241_s26 = sshll.u32 %s1574_s25, 3  ;;  %v1281_v13 = vld [vmem:[%s1556_s5] ss:$0 sm:$0xff]  ;;  %s1361_s25 = sand.u32 1, %s1124_s10  }
  0x1b   : > { %s1247_s29 = scalar_lea.vmem %s1567_s0, %s1241_s26  ;;  %v1354_v45 = vld [vmem:[%s1554_s3] ss:$0 sm:$0xff]  ;;  %s912_s27 = sshll.u32 %s1361_s25, 6 }
  0x1c   : > { %461 = vmatpush.msra.mxu0 %v395_v1  ;;  %989 = vmatpush.msra.mxu3 %v395_v1  ;;  %v379_v2 = vld [vmem:[%s1247_s29] sm:$0xff]  ;;  %v388_v3 = vld [vmem:[%s1247_s29 + $0x48] sm:$0xff]  ;;  %v389_v5 = vld [vmem:[%s1247_s29 + $0x50] sm:$0xff]  ;;  %s1271_s17 = scalar_lea.vmem %s1568_s2, %s1241_s26  ;;  %s1372_s28 = scalar_lea.vmem [#allocation2], %s912_s27 }
  0x1d   : > { %919 = vmatmul.msk.f32.vlgmr.msra.gmra.mxu0 %vm397_vm0, %v379_v2  ;;  %928 = vmatmul.msk.f32.vlgmr.msra.gmra.mxu3 %vm397_vm0, %v388_v3  ;;  %v380_v4 = vld [vmem:[%s1247_s29 + $0x8] sm:$0xff]  ;;  %v381_v6 = vld [vmem:[%s1247_s29 + $0x10] sm:$0xff]  ;;  %v390_v7 = vld [vmem:[%s1247_s29 + $0x58] sm:$0xff]  ;;  %s1463_s23 = scalar_lea.vmem %s1559_s8, %s1241_s26  ;;  %s761_s16 = sshll.u32 %s1372_s28, 4  ;;  %s762_s16 = int_to_ptr.vmem [resolvable:$true] %s761_s16 }
  0x1e   : > { %v382_v8 = vld [vmem:[%s1247_s29 + $0x18] sm:$0xff]  ;;  %v391_v9 = vld [vmem:[%s1247_s29 + $0x60] sm:$0xff]  ;;  %v392_v11 = vld [vmem:[%s1247_s29 + $0x68] sm:$0xff]  ;;  %s740_s26 = scalar_lea.sflag [#allocation3], %s1361_s25  ;;  %s1058_s2 = scalar_lea.hbm %s1558_s7, 128 }
  0x1f   : > { %v383_v10 = vld [vmem:[%s1247_s29 + $0x20] sm:$0xff]  ;;  %v1276_v12 = vld [vmem:[%s1271_s17 + $0x10] sm:$0xff]  ;;  %v1291_v17 = vld [vmem:[%s1271_s17 + $0x8] sm:$0xff] }
  0x20   : > { %v1284_v14 = vld [vmem:[%s1271_s17] sm:$0xff]  ;;  %v585_v15 = vmul.f32 %v1281_v13, %v1276_v12  ;;  %v584_v18 = vmul.f32 %v1281_v13, %v1291_v17  ;;  %v384_v19 = vld [vmem:[%s1247_s29 + $0x28] sm:$0xff]  ;;  %v393_v20 = vld [vmem:[%s1247_s29 + $0x70] sm:$0xff] }
  0x21   : > { %v583_v16 = vmul.f32 %v1281_v13, %v1284_v14  ;;  %v1298_v21 = vld [vmem:[%s1271_s17 + $0x28] sm:$0xff]  ;;  %v1301_v22 = vld [vmem:[%s1271_s17 + $0x18] sm:$0xff]  ;;  %v385_v25 = vld [vmem:[%s1247_s29 + $0x30] sm:$0xff] }
  0x22   : > { %603 = vadd.xlane.f32.xlu0 %v585_v15  ;;  %601 = vadd.xlane.f32.xlu2 %v584_v18  ;;  %v588_v23 = vmul.f32 %v1281_v13, %v1298_v21  ;;  %v586_v24 = vmul.f32 %v1281_v13, %v1301_v22  ;;  %v394_v26 = vld [vmem:[%s1247_s29 + $0x78] sm:$0xff]  ;;  %v1312_v27 = vld [vmem:[%s1271_s17 + $0x40] sm:$0xff]  ;;  %v1315_v28 = vld [vmem:[%s1271_s17 + $0x30] sm:$0xff] }
  0x23   : > { %599 = vadd.xlane.f32.xlu1 %v583_v16  ;;  %v591_v29 = vmul.f32 %v1281_v13, %v1312_v27  ;;  %v589_v30 = vmul.f32 %v1281_v13, %v1315_v28  ;;  %v386_v31 = vld [vmem:[%s1247_s29 + $0x38] sm:$0xff]  ;;  %v387_v34 = vld [vmem:[%s1247_s29 + $0x40] sm:$0xff]  ;;  %v1336_v36 = vld [vmem:[%s1271_s17 + $0x48] sm:$0xff] }
  0x24   : > { %v1325_v32 = vld [vmem:[%s1271_s17 + $0x58] sm:$0xff]  ;;  %v1333_v35 = vld [vmem:[%s1271_s17 + $0x20] sm:$0xff]  ;;  %v592_v38 = vmul.f32 %v1281_v13, %v1336_v36  ;;  %v521_v43 = vld [vmem:[%s1271_s17 + $0x50] sm:$0xff] }
  0x25   : > { %920 = vmatmul.msk.f32.gmra.mxu0 %vm397_vm0, %v380_v4  ;;  %929 = vmatmul.msk.f32.gmra.mxu3 %vm397_vm0, %v389_v5  ;;  %v594_v33 = vmul.f32 %v1281_v13, %v1325_v32  ;;  %v587_v37 = vmul.f32 %v1281_v13, %v1333_v35  ;;  %v1343_v39 = vld [vmem:[%s1271_s17 + $0x38] sm:$0xff]  ;;  %v523_v40 = vld [vmem:[%s1271_s17 + $0x60] sm:$0xff]  ;;  %v593_v44 = vmul.f32 %v1281_v13, %v521_v43  ;;  %v525_v4 = vld [vmem:[%s1271_s17 + $0x70] sm:$0xff] }
  0x26   : > { %v590_v41 = vmul.f32 %v1281_v13, %v1343_v39  ;;  %v595_v42 = vmul.f32 %v1281_v13, %v523_v40  ;;  %v526_v62 = vld [vmem:[%s1271_s17 + $0x78] sm:$0xff]  ;;  %v524_v5 = vld [vmem:[%s1271_s17 + $0x68] sm:$0xff]  ;;  %s763_s17 = sshll.u32 %s760_s14, 4  ;;  %s764_s17 = int_to_ptr.hbm [resolvable:$true] %s763_s17 }
  0x27   : > { %649 = vmatpush.xpose.msra.mxu1 %v526_v62  ;;  %s1052_s21 = sshra.s32 %s764_s17, 4  ;;  %s1053_s21 = int_to_ptr.hbm [resolvable:$true] %s1052_s21 }
  0x28   : > { %s1054_s22 = scalar_lea.hbm %s1053_s21, 64  ;;  %p1059_p0 = scmp.lt.s32.totalorder %s1053_s21, %s1558_s7 }
  0x29   : > { %p1055_p11 = scmp.ne.s32.totalorder %s1053_s21, %s1054_s22  ;;  %p1060_p1 = scmp.lt.s32.totalorder %s1058_s2, %s1054_s22 }
  0x2a   : > { %609 = vadd.xlane.f32.xlu0 %v588_v23  ;;  %607 = vadd.xlane.f32.xlu2 %v587_v37 }
  0x2b   : > { %605 = vadd.xlane.f32.xlu1 %v586_v24  ;;  %650 = vmatpush.xpose.msra.mxu1 %v525_v4  ;;  %p1056_p12 = pnand %p1055_p11, %p1224_p5  ;;  %p1061_p2 = por %p1060_p1, %p1059_p0 }
  0x2d   : > { %921 = vmatmul.msk.f32.gmra.mxu0 %vm397_vm0, %v381_v6  ;;  %930 = vmatmul.msk.f32.gmra.mxu3 %vm397_vm0, %v390_v7  ;;  %p1057_p13 = pneg %p1056_p12 }
  0x2f   : > { %651 = vmatpush.xpose.msra.mxu1 %v524_v5  ;;  %p1062_p3 = pnand %p1061_p2, %p1057_p13 }
  0x32   : > { %615 = vadd.xlane.f32.xlu0 %v591_v29  ;;  %613 = vadd.xlane.f32.xlu2 %v590_v41 }
  0x33   : > { %611 = vadd.xlane.f32.xlu1 %v589_v30  ;;  %652 = vmatpush.xpose.msra.mxu1 %v523_v40  ;;  %v597_v30 = vmul.f32 %v1281_v13, %v525_v4 }
  0x35   : > { %922 = vmatmul.msk.f32.gmra.mxu0 %vm397_vm0, %v382_v8  ;;  %931 = vmatmul.msk.f32.gmra.mxu3 %vm397_vm0, %v391_v9 }
  0x37   : > { %653 = vmatpush.xpose.msra.mxu1 %v1325_v32  ;;  %v598_v32 = vmul.f32 %v1281_v13, %v526_v62 }
  0x3a   : > { %621 = vadd.xlane.f32.xlu0 %v594_v33  ;;  %619 = vadd.xlane.f32.xlu2 %v593_v44 }
  0x3b   : > { %617 = vadd.xlane.f32.xlu1 %v592_v38  ;;  %654 = vmatpush.xpose.msra.mxu1 %v521_v43 }
  0x3d   : > { %923 = vmatmul.msk.f32.gmra.mxu0 %vm397_vm0, %v383_v10  ;;  %932 = vmatmul.msk.f32.gmra.mxu3 %vm397_vm0, %v392_v11 }
  0x3f   : > { %655 = vmatpush.xpose.msra.mxu1 %v1336_v36 }
  0x43   : > { %623 = vadd.xlane.f32.xlu1 %v595_v42  ;;  %656 = vmatpush.xpose.msra.mxu1 %v1312_v27  ;;  %v596_v27 = vmul.f32 %v1281_v13, %v524_v5  ;;  %v648_v13 = vld [vmem:[%s1557_s6] sm:$0x1] }
  0x45   : > { %924 = vmatmul.msk.f32.gmra.mxu0 %vm397_vm0, %v384_v19  ;;  %933 = vmatmul.msk.f32.gmra.mxu3 %vm397_vm0, %v393_v20 }
  0x47   : > { %657 = vmatpush.xpose.msra.mxu1 %v1343_v39  ;;  %v647_v39 = vld [vmem:[%s1555_s4] sm:$0x1] }
  0x4b   : > { %658 = vmatpush.xpose.msra.mxu1 %v1315_v28 }
  0x4d   : > { %925 = vmatmul.msk.f32.gmra.mxu0 %vm397_vm0, %v385_v25  ;;  %934 = vmatmul.msk.f32.gmra.mxu3 %vm397_vm0, %v394_v26 }
  0x4f   : > { %659 = vmatpush.xpose.msra.mxu1 %v1298_v21 }
  0x53   : > { %660 = vmatpush.xpose.msra.mxu1 %v1333_v35 }
  0x55   : > { %926 = vmatmul.msk.f32.gmra.mxu0 %vm397_vm0, %v386_v31 }
  0x57   : > { %661 = vmatpush.xpose.msra.mxu1 %v1301_v22 }
  0x5b   : > { %662 = vmatpush.xpose.msra.mxu1 %v1276_v12 }
  0x5d   : > { %927 = vmatmul.msk.f32.gmra.mxu0 %vm397_vm0, %v387_v34 }
  0x5f   : > { %663 = vmatpush.xpose.msra.mxu1 %v1291_v17 }
  0x63   : > { %664 = vmatpush.xpose.msra.mxu1 %v1284_v14 }
  0x66   : > { %665 = vmatmul.f32.vlgmr.msra.gmra.mxu1 %v648_v13 }
  0x95   : > { %v1433_v36 = vpop.xlane.xlu0 %603  ;;  %v602_v12 = vpop.xlane.xlu2 %601 }
  0x96   : > { %v600_v28 = vpop.xlane.xlu1 %599 }
  0x9a   : > { %v1356_v46 = vpop.f32.mrf.mxu0 }
  0x9b   : > { %v531_v47 = vmul.f32 %v1354_v45, %v1356_v46 }
  0x9d   : > { %547 = vadd.xlane.f32.xlu0 %v531_v47  ;;  %v1439_v21 = vpop.xlane.xlu0 %609  ;;  %v608_v37 = vpop.xlane.xlu2 %607 }
  0x9e   : > { %v1445_v35 = vpop.xlane.xlu1 %605 }
  0xa0   : > { %v1364_v48 = vpop.f32.mrf.mxu3 }
  0xa1   : > { %v540_v51 = vmul.f32 %v1354_v45, %v1364_v48 }
  0xa2   : > { %v1366_v49 = vpop.f32.mrf.mxu0 }
  0xa3   : > { %v944_v50 = vpack.c.bf16 %v1366_v49, %v1356_v46  ;;  %v532_v54 = vmul.f32 %v1354_v45, %v1366_v49 }
  0xa5   : > { %945 = vst [vmem:[%s1372_s28] sm:$0xff] %v944_v50   ;;  %565 = vadd.xlane.f32.xlu0 %v540_v51  ;;  %v1447_v22 = vpop.xlane.xlu0 %615  ;;  %v614_v42 = vpop.xlane.xlu2 %613 }
  0xa6   : > { %v1450_v17 = vpop.xlane.xlu1 %611 }
  0xa8   : > { %v1375_v52 = vpop.f32.mrf.mxu3 }
  0xa9   : > { %v541_v53 = vmul.f32 %v1354_v45, %v1375_v52 }
  0xaa   : > { %v1381_v55 = vpop.f32.mrf.mxu0 }
  0xab   : > { %567 = vadd.xlane.f32.xlu1 %v541_v53  ;;  %v533_v56 = vmul.f32 %v1354_v45, %v1381_v55 }
  0xad   : > { %549 = vadd.xlane.f32.xlu0 %v532_v54  ;;  %v622_v14 = vpop.xlane.xlu0 %621 }
  0xae   : > { %v618_v38 = vpop.xlane.xlu1 %617 }
  0xb0   : > { %v1385_v57 = vpop.f32.mrf.mxu3 }
  0xb1   : > { %v969_v58 = vpack.c.bf16 %v1385_v57, %v1375_v52  ;;  %v542_v59 = vmul.f32 %v1354_v45, %v1385_v57 }
  0xb2   : > { %v1391_v60 = vpop.f32.mrf.mxu0 }
  0xb3   : > { %985 = vst [vmem:[%s1372_s28 + $0x28] sm:$0xff] %v969_v58   ;;  %v949_v61 = vpack.c.bf16 %v1391_v60, %v1381_v55  ;;  %569 = vadd.xlane.f32.xlu2 %v542_v59  ;;  %551 = vadd.xlane.f32.xlu1 %v533_v56  ;;  %v534_v63 = vmul.f32 %v1354_v45, %v1391_v60 }
  0xb5   : > { %981 = vst [vmem:[%s1372_s28 + $0x8] sm:$0xff] %v949_v61  }
  0xb6   : > { %v624_v43 = vpop.xlane.xlu1 %623 }
  0xb8   : > { %v499_v0 = vpop.f32.mrf.mxu3 }
  0xb9   : > { %v543_v1 = vmul.f32 %v1354_v45, %v499_v0 }
  0xba   : > { %v1401_v2 = vpop.f32.mrf.mxu0 }
  0xbb   : > { %571 = vadd.xlane.f32.xlu0 %v543_v1  ;;  %553 = vadd.xlane.f32.xlu1 %v534_v63  ;;  %v535_v3 = vmul.f32 %v1354_v45, %v1401_v2 }
  0xbd   : > { %555 = vadd.xlane.f32.xlu2 %v535_v3 }
  0xc0   : > { %v502_v6 = vpop.f32.mrf.mxu3 }
  0xc1   : > { %v974_v7 = vpack.c.bf16 %v502_v6, %v499_v0  ;;  %v544_v8 = vmul.f32 %v1354_v45, %v502_v6 }
  0xc2   : > { %v478_v9 = vpop.f32.mrf.mxu0 }
  0xc3   : > { %986 = vst [vmem:[%s1372_s28 + $0x30] sm:$0xff] %v974_v7   ;;  %v954_v10 = vpack.c.bf16 %v478_v9, %v1401_v2  ;;  %573 = vadd.xlane.f32.xlu1 %v544_v8  ;;  %v536_v11 = vmul.f32 %v1354_v45, %v478_v9 }
  0xc5   : > { %982 = vst [vmem:[%s1372_s28 + $0x10] sm:$0xff] %v954_v10   ;;  %557 = vadd.xlane.f32.xlu2 %v536_v11 }
  0xc8   : > { %v505_v15 = vpop.f32.mrf.mxu3 }
  0xc9   : > { %v545_v18 = vmul.f32 %v1354_v45, %v505_v15 }
  0xca   : > { %v481_v16 = vpop.f32.mrf.mxu0 }
  0xcb   : > { %v537_v19 = vmul.f32 %v1354_v45, %v481_v16 }
  0xcd   : > { %575 = vadd.xlane.f32.xlu2 %v545_v18  ;;  %559 = vadd.xlane.f32.xlu0 %v537_v19 }
  0xd0   : > { %v508_v20 = vpop.f32.mrf.mxu3 }
  0xd1   : > { %v979_v23 = vpack.c.bf16 %v508_v20, %v505_v15  ;;  %669 = vmatpush.xpose.msra.mxu2 %v508_v20  ;;  %v546_v26 = vmul.f32 %v1354_v45, %v508_v20 }
  0xd2   : > { %v484_v24 = vpop.f32.mrf.mxu0 }
  0xd3   : > { %987 = vst [vmem:[%s1372_s28 + $0x38] sm:$0xff] %v979_v23   ;;  %v959_v25 = vpack.c.bf16 %v484_v24, %v481_v16  ;;  %v538_v29 = vmul.f32 %v1354_v45, %v484_v24 }
  0xd5   : > { %983 = vst [vmem:[%s1372_s28 + $0x18] sm:$0xff] %v959_v25   ;;  %670 = vmatpush.xpose.msra.mxu2 %v505_v15  ;;  %577 = vadd.xlane.f32.xlu0 %v546_v26 }
  0xd6   : > { %561 = vadd.xlane.f32.xlu1 %v538_v29 }
  0xd9   : > { %671 = vmatpush.xpose.msra.mxu2 %v502_v6 }
  0xda   : > { %v487_v31 = vpop.f32.mrf.mxu0 }
  0xdb   : > { %v964_v33 = vpack.c.bf16 %v1364_v48, %v487_v31  ;;  %v539_v34 = vmul.f32 %v1354_v45, %v487_v31 }
  0xdd   : > { %984 = vst [vmem:[%s1372_s28 + $0x20] sm:$0xff] %v964_v33   ;;  %672 = vmatpush.xpose.msra.mxu2 %v499_v0  ;;  %627 = vadd.xlane.f32.xlu0 %v597_v30 }
  0xde   : > { %629 = vadd.xlane.f32.xlu1 %v598_v32  ;;  %563 = vadd.xlane.f32.xlu2 %v539_v34 }
  0xe1   : > { %673 = vmatpush.xpose.msra.mxu2 %v1385_v57 }
  0xe5   : > { %674 = vmatpush.xpose.msra.mxu2 %v1375_v52 }
  0xe6   : > { %625 = vadd.xlane.f32.xlu2 %v596_v27 }
  0xe9   : > { %675 = vmatpush.xpose.msra.mxu2 %v1364_v48 }
  0xed   : > { %676 = vmatpush.xpose.msra.mxu2 %v487_v31 }
  0xf1   : > { %677 = vmatpush.xpose.msra.mxu2 %v484_v24 }
  0xf5   : > { %678 = vmatpush.xpose.msra.mxu2 %v481_v16 }
  0xf9   : > { %679 = vmatpush.xpose.msra.mxu2 %v478_v9 }
  0xfd   : > { %680 = vmatpush.xpose.msra.mxu2 %v1401_v2 }
 0x101   : > { %681 = vmatpush.xpose.msra.mxu2 %v1391_v60 }
 0x105   : > { %682 = vmatpush.xpose.msra.mxu2 %v1381_v55 }
 0x109   : > { %683 = vmatpush.xpose.msra.mxu2 %v1366_v49 }
 0x10d   : > { %684 = vmatpush.xpose.msra.mxu2 %v1356_v46 }
 0x110   : > { %v548_v40 = vpop.xlane.xlu0 %547  ;;  %685 = vmatmul.f32.vlgmr.msra.gmra.mxu2 %v647_v39 }
 0x111   : > { %v631_v41 = vadd.f32 %v600_v28, %v548_v40 }
 0x113   : > { %722 = vst.msk [vmem:[%s1463_s23] sm:$0xff] %vm721_vm1, %v631_v41 }
 0x118   : > { %v566_v44 = vpop.xlane.xlu0 %565 }
 0x119   : > { %v640_v45 = vadd.f32 %v618_v38, %v566_v44 }
 0x11a   : > { %1065 = shalt.err (!%p1062_p3)
}
 0x11b   : > { %s1134_s28 = smov 64   ;;  %s1135_s29 = smov 4   ;;  %731 = vst.msk [vmem:[%s1463_s23 + $0x48] sm:$0xff] %vm721_vm1, %v640_v45  ;;  %v620_v46 = vpop.xlane.xlu2 %619  ;;  %v666_v18 = vpop.f32.mrf.mxu1 }
 0x11c   : > { %990 = dma.vmem_to_hbm [thread:$0]  (%p1224_p5), %s762_s16, 1024, %s764_s17, %s740_s26, %s1134_s28, %s1134_s28, %s1135_s29  }
 0x11d   : > { %s779_s2 = scalar_lea.hbm %s1560_s9, %s1207_s13  ;;  %s359_s14 = scalar_lea.vmem [#allocation4], %s1361_s25 }
 0x11e   : > { %v568_v47 = vpop.xlane.xlu1 %567  ;;  %s781_s16 = sshll.u32 %s359_s14, 4  ;;  %s783_s17 = sshll.u32 %s779_s2, 4  ;;  %s782_s16 = int_to_ptr.vmem [resolvable:$true] %s781_s16  ;;  %s784_s17 = int_to_ptr.hbm [resolvable:$true] %s783_s17 }
 0x11f   : > { %v641_v48 = vadd.f32 %v620_v46, %v568_v47  ;;  %s750_s26 = scalar_lea.sflag [#allocation5], %s1361_s25  ;;  %s1080_s21 = sshra.s32 %s784_s17, 4  ;;  %s1081_s21 = int_to_ptr.hbm [resolvable:$true] %s1080_s21 }
 0x120   : > { %v550_v49 = vpop.xlane.xlu0 %549  ;;  %s1082_s22 = scalar_lea.hbm %s1081_s21, 1  ;;  %s1086_s13 = scalar_lea.hbm %s1560_s9, 2 }
 0x121   : > { %732 = vst.msk [vmem:[%s1463_s23 + $0x50] sm:$0xff] %vm721_vm1, %v641_v48  ;;  %v632_v50 = vadd.f32 %v602_v12, %v550_v49  ;;  %p1083_p4 = scmp.ne.s32.totalorder %s1081_s21, %s1082_s22  ;;  %p1087_p9 = scmp.lt.s32.totalorder %s1081_s21, %s1560_s9 }
 0x122   : > { %p1088_p10 = scmp.lt.s32.totalorder %s1086_s13, %s1082_s22 }
 0x123   : > { %723 = vst.msk [vmem:[%s1463_s23 + $0x8] sm:$0xff] %vm721_vm1, %v632_v50  ;;  %p1084_p7 = pnand %p1083_p4, %p1224_p5 }
 0x124   : > { %p1089_p11 = por %p1088_p10, %p1087_p9 }
 0x125   : > { %p1085_p8 = pneg %p1084_p7 }
 0x126   : > { %v570_v51 = vpop.xlane.xlu2 %569  ;;  %v552_v52 = vpop.xlane.xlu1 %551 }
 0x127   : > { %v642_v53 = vadd.f32 %v622_v14, %v570_v51  ;;  %v633_v54 = vadd.f32 %v1433_v36, %v552_v52  ;;  %p1090_p12 = pnand %p1089_p11, %p1085_p8 }
 0x129   : > { %733 = vst.msk [vmem:[%s1463_s23 + $0x58] sm:$0xff] %vm721_vm1, %v642_v53 }
 0x12a   : > { %724 = vst.msk [vmem:[%s1463_s23 + $0x10] sm:$0xff] %vm721_vm1, %v633_v54 }
 0x12e   : > { %v572_v55 = vpop.xlane.xlu0 %571  ;;  %v554_v56 = vpop.xlane.xlu1 %553 }
 0x12f   : > { %v643_v57 = vadd.f32 %v624_v43, %v572_v55  ;;  %v634_v58 = vadd.f32 %v1445_v35, %v554_v56 }
 0x130   : > { %v556_v59 = vpop.xlane.xlu2 %555 }
 0x131   : > { %734 = vst.msk [vmem:[%s1463_s23 + $0x60] sm:$0xff] %vm721_vm1, %v643_v57  ;;  %v635_v60 = vadd.f32 %v608_v37, %v556_v59 }
 0x132   : > { %725 = vst.msk [vmem:[%s1463_s23 + $0x18] sm:$0xff] %vm721_vm1, %v634_v58 }
 0x133   : > { %726 = vst.msk [vmem:[%s1463_s23 + $0x20] sm:$0xff] %vm721_vm1, %v635_v60 }
 0x136   : > { %v574_v0 = vpop.xlane.xlu1 %573 }
 0x138   : > { %v558_v61 = vpop.xlane.xlu2 %557 }
 0x139   : > { %v636_v62 = vadd.f32 %v1439_v21, %v558_v61 }
 0x13b   : > { %727 = vst.msk [vmem:[%s1463_s23 + $0x28] sm:$0xff] %vm721_vm1, %v636_v62 }
 0x140   : > { %v560_v63 = vpop.xlane.xlu0 %559  ;;  %v576_v3 = vpop.xlane.xlu2 %575 }
 0x141   : > { %v637_v1 = vadd.f32 %v1450_v17, %v560_v63 }
 0x143   : > { %728 = vst.msk [vmem:[%s1463_s23 + $0x30] sm:$0xff] %vm721_vm1, %v637_v1 }
 0x148   : > { %v578_v2 = vpop.xlane.xlu0 %577 }
 0x149   : > { %v562_v4 = vpop.xlane.xlu1 %561 }
 0x14a   : > { %v638_v5 = vadd.f32 %v614_v42, %v562_v4 }
 0x14c   : > { %729 = vst.msk [vmem:[%s1463_s23 + $0x38] sm:$0xff] %vm721_vm1, %v638_v5 }
 0x150   : > { %v628_v6 = vpop.xlane.xlu0 %627 }
 0x151   : > { %v645_v7 = vadd.f32 %v628_v6, %v576_v3  ;;  %v630_v8 = vpop.xlane.xlu1 %629  ;;  %v564_v9 = vpop.xlane.xlu2 %563 }
 0x152   : > { %v646_v10 = vadd.f32 %v630_v8, %v578_v2  ;;  %v639_v11 = vadd.f32 %v1447_v22, %v564_v9 }
 0x153   : > { %736 = vst.msk [vmem:[%s1463_s23 + $0x70] sm:$0xff] %vm721_vm1, %v645_v7 }
 0x154   : > { %737 = vst.msk [vmem:[%s1463_s23 + $0x78] sm:$0xff] %vm721_vm1, %v646_v10 }
 0x155   : > { %730 = vst.msk [vmem:[%s1463_s23 + $0x40] sm:$0xff] %vm721_vm1, %v639_v11 }
 0x159   : > { %v626_v15 = vpop.xlane.xlu2 %625 }
 0x15a   : > { %v644_v16 = vadd.f32 %v626_v15, %v574_v0 }
 0x15c   : > { %735 = vst.msk [vmem:[%s1463_s23 + $0x68] sm:$0xff] %vm721_vm1, %v644_v16 }
 0x193   : > { %v686_v19 = vpop.f32.mrf.mxu2 }
 0x194   : > { %v687_v20 = vadd.f32 %v686_v19, %v666_v18 }
 0x196   : > { %738 = vst [vmem:[%s359_s14] sm:$0x1] %v687_v20 }
 0x197   : > { %1093 = shalt.err (!%p1090_p12)
}
 0x198   : > { %991 = dma.vmem_to_hbm [thread:$0]  (%p1224_p5), %s782_s16, 16, %s784_s17, %s750_s26  }
 0x199 PF: > { %p1001_p13 = scmp.ge.s32.totalorder %s1132_s12, 2  ;;  %s795_s25 = sand.u32 1, %s1120_s30  }
 0x19a   : > { %s796_s29 = scalar_lea.sflag [#allocation3], %s795_s25 }
 0x19b   : > { %p995_p0 = pnand %p1001_p13, %p1228_p6 }
 0x19d   : > { %p996_p1 = pneg %p995_p0 }
 0x19f   : > { %1111 = dma.done.wait (%p996_p1), %s796_s29, 1024  }
 0x1a0   : > { %1113 = vsyncadd (%p996_p1), %s796_s29, 4294966272  ;;  %s814_s0 = scalar_lea.sflag [#allocation5], %s795_s25 }
 0x1a1   : > { %1115 = dma.done.wait (%p996_p1), %s814_s0, 16  }
 0x1a2   : > { %1117 = vsyncadd (%p996_p1), %s814_s0, 4294967280  ;;  %p23_p5 = scmp.ge.s32.totalorder %s1211_s15, 4   ;;  %s1569_s30 = smov %s1124_s10 }
 0x1a3   : > { %s1570_s10 = smov %s1128_s11  ;;  %s1571_s11 = smov %s1222_s18 }
 0x1a4   : > { %s1572_s12 = smov %s1211_s15  ;;  %25 = sbr.rel (!%p23_p5) target bundleno = 9 (0x9), region = 115 }
 0x1a9   :  { %819 = vsyncpa [#allocation3], 1 }
 0x1aa   :  { %821 = vsyncpa [#allocation3 + $0x1], 1 }
 0x1ab   :  { %822 = vsyncpa [#allocation5], 1 }
 0x1ac   :  { %824 = vsyncpa [#allocation5 + $0x1], 1 }

</bundles_post_ra>
